<compile_context>
chip_gen: v7x
topology: tpu7x:2x2x1
jax: 0.10.0
libtpu: 0.0.40
codegen_flags: <defaults>
</compile_context>

<pallas_src>
import functools

import jax
import jax.numpy as jnp
from jax.experimental import pallas as pl
from jax.experimental.pallas import tpu as pltpu

_LANE = 128
# Fits the default scoped-VMEM of v6e/v7x and raises v5e's 16 MiB default;
# well under v7x's 64 MiB physical VMEM, so safe on every generation.
_VMEM_LIMIT_BYTES = 32 * 1024 * 1024
# Keep Z resident (single copy <= this) so its double-buffered footprint plus
# A tiles / accumulator / output stays under the 32 MiB limit.
_Z_RESIDENT_MAX_BYTES = 10 * 1024 * 1024


def _round_up(x, m):
    return (x + m - 1) // m * m


def _pad_to(x, rows, cols):
    pr, pc = rows - x.shape[0], cols - x.shape[1]
    if pr == 0 and pc == 0:
        return x
    return jnp.pad(x, ((0, pr), (0, pc)))


def _choose_tiles(n):
    """Return (tm, tk): row tile and reduction (K) tile for the aggregation."""
    if n <= _LANE:
        return _LANE, _LANE                       # single block
    if n <= 1024:
        # >=2 row tiles so the 'parallel' axis can shard across v7x's 2 TCs;
        # the whole (padded) width is a single K block.
        rows = _round_up(n, 2 * _LANE)
        return rows // 2, _round_up(n, _LANE)
    # Large graphs: big tiles to amortize the per-step pipeline overhead.
    # A tile = 512 KiB int8; double-buffered ~1 MiB.
    return 512, 1024


def _row_tile(nrows):
    """Row tile for the dense transform kernel (nrows is a multiple of 128)."""
    for t in (512, 256, 128):
        if nrows % t == 0:
            return t
    return nrows


# --------------------------------------------------------------------------
# Kernels
# --------------------------------------------------------------------------
def _gcn_agg_kernel(*refs, fuse_w, apply_relu, prescale_out, z_resident, tk):
    """acc += A_ik @ Z_k ; epilogue: act(d_i * acc [@ W] + b) [* d_i]."""
    if fuse_w:
        a_ref, z_ref, di_ref, w_ref, b_ref, o_ref, acc_ref = refs
    else:
        a_ref, z_ref, di_ref, b_ref, o_ref, acc_ref = refs
        w_ref = None

    k = pl.program_id(1)

    @pl.when(k == 0)
    def _():
        acc_ref[...] = jnp.zeros_like(acc_ref)

    # A is carried as int8 purely to halve its HBM traffic; upcast to bf16
    # for the MXU (VPU work that hides under the A-tile DMA).
    a = a_ref[...].astype(jnp.float32).astype(jnp.bfloat16)
    if z_resident:
        # Z has a constant block index -> fetched into VMEM once; slice the
        # current K tile out of the resident copy.
        start = pl.multiple_of(k * tk, _LANE)
        zk = z_ref[pl.ds(start, tk), :]
    else:
        zk = z_ref[...]
    acc_ref[...] += jnp.dot(a, zk, preferred_element_type=jnp.float32)

    @pl.when(k == pl.num_programs(1) - 1)
    def _():
        di = di_ref[...]
        y = acc_ref[...] * di                     # destination-side d^{-1/2}
        if fuse_w:
            y = jnp.dot(y.astype(jnp.bfloat16), w_ref[...],
                        preferred_element_type=jnp.float32)
        y = y + b_ref[...]                        # (1, F_out) broadcast
        if apply_relu:
            y = jnp.maximum(y, 0.0)
        if prescale_out:
            # Source-side d^{-1/2} of the *next* layer, folded in here so the
            # aggregation loop never rescales Z per step.  Also zeroes padded
            # rows (d is zero-padded beyond N).
            y = y * di
        o_ref[...] = y.astype(o_ref.dtype)


def _xw_kernel(x_ref, w_ref, o_ref):
    """Row-tiled dense feature transform: O = X @ W."""
    o_ref[...] = jnp.dot(x_ref[...], w_ref[...],
                         preferred_element_type=jnp.float32).astype(o_ref.dtype)


# --------------------------------------------------------------------------
# pallas_call wrappers
# --------------------------------------------------------------------------
def gcn_aggregate(a, z, d_rows, w, b, *, apply_relu, prescale_out, out_dtype,
                  tm, tk, z_resident):
    """[d_i *] act( d_i * (A @ Z) [@ W] + b ), tiled over (row blocks, K)."""
    n_rows, n_cols = a.shape
    f_mid = z.shape[1]
    fuse_w = w is not None
    f_out = w.shape[1] if fuse_w else b.shape[1]
    grid = (n_rows // tm, n_cols // tk)

    if z_resident:
        z_spec = pl.BlockSpec((n_cols, f_mid), lambda i, k: (0, 0))
    else:
        z_spec = pl.BlockSpec((tk, f_mid), lambda i, k: (k, 0))

    in_specs = [
        pl.BlockSpec((tm, tk), lambda i, k: (i, k)),      # A tile (int8)
        z_spec,                                           # Z (pre-scaled by d)
        pl.BlockSpec((tm, 1), lambda i, k: (i, 0)),       # d^{-1/2}, dest side
    ]
    args = [a, z, d_rows]
    if fuse_w:
        in_specs.append(pl.BlockSpec((f_mid, f_out), lambda i, k: (0, 0)))
        args.append(w)
    in_specs.append(pl.BlockSpec((1, f_out), lambda i, k: (0, 0)))
    args.append(b)

    kernel = functools.partial(
        _gcn_agg_kernel, fuse_w=fuse_w, apply_relu=apply_relu,
        prescale_out=prescale_out, z_resident=z_resident, tk=tk)
    return pl.pallas_call(
        kernel,
        out_shape=jax.ShapeDtypeStruct((n_rows, f_out), out_dtype),
        grid=grid,
        in_specs=in_specs,
        out_specs=pl.BlockSpec((tm, f_out), lambda i, k: (i, 0)),
        scratch_shapes=[pltpu.VMEM((tm, f_mid), jnp.float32)],
        compiler_params=pltpu.CompilerParams(
            dimension_semantics=("parallel", "arbitrary"),
            vmem_limit_bytes=_VMEM_LIMIT_BYTES),
    )(*args)


def gcn_transform(x, w, *, tm):
    """Z = X @ W, row-tiled (used once per layer when f_in_pad > f_out_pad)."""
    n, f_in = x.shape
    f_out = w.shape[1]
    return pl.pallas_call(
        _xw_kernel,
        out_shape=jax.ShapeDtypeStruct((n, f_out), jnp.bfloat16),
        grid=(n // tm,),
        in_specs=[pl.BlockSpec((tm, f_in), lambda i: (i, 0)),
                  pl.BlockSpec((f_in, f_out), lambda i: (0, 0))],
        out_specs=pl.BlockSpec((tm, f_out), lambda i: (i, 0)),
        compiler_params=pltpu.CompilerParams(
            dimension_semantics=("parallel",)),
    )(x, w)


# --------------------------------------------------------------------------
# Model
# --------------------------------------------------------------------------
class GCNPallas:
    """GCN(in_feats, n_hidden, n_classes, n_layers=2, activation=relu, dropout=0.5)."""

    def __init__(self, in_feats, n_hidden, n_classes, n_layers=2, key=None):
        if key is None:
            key = jax.random.PRNGKey(0)
        dims = [in_feats] + [n_hidden] * n_layers + [n_classes]
        self.n_classes = n_classes
        self.params = []    # unpadded f32 (w, b), for reference checks
        self._layers = []   # padded / bf16 tensors used by the kernels
        for li in range(len(dims) - 1):
            key, wk = jax.random.split(key)
            f_in, f_out = dims[li], dims[li + 1]
            # Glorot-uniform init, like DGL GraphConv reset_parameters.
            limit = (6.0 / (f_in + f_out)) ** 0.5
            w = jax.random.uniform(wk, (f_in, f_out), jnp.float32, -limit, limit)
            b = jnp.zeros((f_out,), jnp.float32)
            self.params.append((w, b))

            f_in_pad = _round_up(f_in, _LANE)
            f_out_pad = _round_up(f_out, _LANE)
            w_pad = _pad_to(w, f_in_pad, f_out_pad).astype(jnp.bfloat16)
            b_pad = _pad_to(b.reshape(1, f_out), 1, f_out_pad)  # stays f32
            self._layers.append((w_pad, b_pad, f_in, f_out, f_in_pad, f_out_pad))

    def __call__(self, adj, features, *, tiles=None, z_resident=None):
        n = adj.shape[0]

        # Symmetric-norm factor d^{-1/2} (degrees clamped to >= 1); A_hat is
        # never materialized — d is folded into the kernels' epilogues / the
        # pre-scaled Z.
        deg = jnp.maximum(adj.sum(axis=1), 1.0)
        d = (deg ** -0.5).astype(jnp.float32).reshape(n, 1)

        tm, tk = tiles if tiles is not None else _choose_tiles(n)
        n_rows_pad = _round_up(n, tm)        # rows and cols of A padded
        n_cols_pad = _round_up(n, tk)        # independently

        # Binary adjacency stored as int8 (edge_weight=None in the module).
        # TODO(synk): a weighted adjacency would need bf16 storage here.
        a = _pad_to(adj, n_rows_pad, n_cols_pad).astype(jnp.int8)
        d_rows = _pad_to(d, n_rows_pad, 1)    # zero beyond N (kills pad rows)

        # Pre-scale the input features by d^{-1/2} once (source-side norm);
        # later layers carry this scaling out of the previous epilogue.
        f_in_pad0 = self._layers[0][4]
        h = features.astype(jnp.float32) * d
        h = _pad_to(h, n_cols_pad, f_in_pad0).astype(jnp.bfloat16)

        n_total = len(self._layers)
        for li, (w_pad, b_pad, _, _, f_in_pad, f_out_pad) in enumerate(self._layers):
            last = li == n_total - 1
            # Dropout between layers: identity in eval mode.

            # Matmul-order dispatch on *padded* widths.
            if f_in_pad <= f_out_pad:
                z, w_arg, f_mid = h, w_pad, f_in_pad       # fuse W in epilogue
            else:
                z = gcn_transform(h, w_pad, tm=_row_tile(n_cols_pad))
                w_arg, f_mid = None, f_out_pad             # aggregate narrow Z

            z_res = z_resident
            if z_res is None:
                z_res = (n_cols_pad * f_mid * 2) <= _Z_RESIDENT_MAX_BYTES

            h = gcn_aggregate(
                a, z, d_rows, w_arg, b_pad,
                apply_relu=not last,
                prescale_out=not last,
                out_dtype=jnp.float32 if last else jnp.bfloat16,
                tm=tm, tk=tk, z_resident=z_res)

            # Re-align the node axis to the (column-padded) Z row space for
            # the next layer; padded rows are already zero (d_i prescale).
            if not last and h.shape[0] != n_cols_pad:
                if h.shape[0] < n_cols_pad:
                    h = jnp.pad(h, ((0, n_cols_pad - h.shape[0]), (0, 0)))
                else:
                    h = h[:n_cols_pad, :]

        return h[:n, :self.n_classes]


def _reference_forward(adj, features, params):
    """Pure-JAX f32 reference: act(A_hat @ (H @ W) + b) per layer."""
    deg = jnp.maximum(adj.sum(axis=1), 1.0)
    dis = deg ** -0.5
    a_hat = dis[:, None] * adj * dis[None, :]
    h = features
    for li, (w, b) in enumerate(params):
        h = a_hat @ (h @ w) + b
        if li != len(params) - 1:
            h = jnp.maximum(h, 0.0)
    return h


if __name__ == "__main__":
    def run_case(key, n, in_feats, n_hidden, n_classes, n_layers,
                 tiles=None, z_resident=None):
        k_adj, k_feat, k_model = jax.random.split(key, 3)
        a_rand = jax.random.uniform(k_adj, (n, n))
        adj = (a_rand < 0.15).astype(jnp.float32)
        adj = jnp.maximum(adj, adj.T)
        adj = jnp.maximum(adj, jnp.eye(n, dtype=jnp.float32))
        features = jax.random.normal(k_feat, (n, in_feats), jnp.float32)

        model = GCNPallas(in_feats, n_hidden, n_classes, n_layers=n_layers,
                          key=k_model)
        out = jax.block_until_ready(
            model(adj, features, tiles=tiles, z_resident=z_resident))

        assert out.shape == (n, n_classes), out.shape
        assert jnp.all(jnp.isfinite(out))
        ref = _reference_forward(adj, features, model.params)
        max_err = float(jnp.max(jnp.abs(out - ref)))
        assert max_err < 0.25, f"max abs error vs reference: {max_err}"

    root = jax.random.PRNGKey(0)
    k1, k2 = jax.random.split(root)

    # 1) Tiny graph: single-block tiles, all layers on the fused-W path.
    run_case(k1, n=32, in_feats=16, n_hidden=32, n_classes=8, n_layers=2)

    # 2) Padded multi-tile path: unfused first layer (f_in_pad > f_out_pad),
    #    2 row tiles, independent row/col padding, resident Z.
    run_case(k2, n=300, in_feats=200, n_hidden=64, n_classes=5, n_layers=2)

    # 3) Same graph with forced small K tiles + streamed Z: exercises the
    #    multi-step reduction (k > 1) and the non-resident Z branch.
    run_case(k2, n=300, in_feats=200, n_hidden=64, n_classes=5, n_layers=2,
             tiles=(256, 128), z_resident=False)

    print("KERNEL_OK")
</pallas_src>

<mosaic_0001>
module attributes {stable_mosaic.version = 11 : i64} {
  func.func @_gcn_agg_kernel(%arg0: i32, %arg1: i32, %arg2: memref<128x128xi8, #tpu.memory_space<vmem>>, %arg3: memref<128x128xbf16, #tpu.memory_space<vmem>>, %arg4: memref<128x1xf32, #tpu.memory_space<vmem>>, %arg5: memref<128x128xbf16, #tpu.memory_space<vmem>>, %arg6: memref<1x128xf32, #tpu.memory_space<vmem>>, %arg7: memref<128x128xbf16, #tpu.memory_space<vmem>>, %arg8: memref<128x128xf32, #tpu.memory_space<vmem>>) attributes {dimension_semantics = [#tpu.dimension_semantics<parallel>, #tpu.dimension_semantics<arbitrary>], iteration_bounds = array<i64: 1, 1>, scalar_prefetch = 0 : i64, scratch_operands = 1 : i64, tpu.core_type = #tpu.core_type<tc>, window_params = [{transform_indices = @transform_0, window_bounds = array<i64: 128, 128>}, {pipeline_mode = #tpu.pipeline_mode<synchronous>, transform_indices = @transform_1, window_bounds = array<i64: 128, 128>}, {transform_indices = @transform_2, window_bounds = array<i64: 128, 1>}, {pipeline_mode = #tpu.pipeline_mode<synchronous>, transform_indices = @transform_3, window_bounds = array<i64: 128, 128>}, {pipeline_mode = #tpu.pipeline_mode<synchronous>, transform_indices = @transform_4, window_bounds = array<i64: 1, 128>}, {transform_indices = @transform_5, window_bounds = array<i64: 128, 128>}]} {
    %c0_i32 = arith.constant 0 : i32
    %0 = arith.cmpi eq, %arg1, %c0_i32 : i32
    %1 = arith.extui %0 : i1 to i32
    %c0_i32_0 = arith.constant 0 : i32
    %2 = arith.cmpi ne, %1, %c0_i32_0 : i32
    scf.if %2 {
      %cst_9 = arith.constant 0.000000e+00 : f32
      %17 = vector.broadcast %cst_9 : f32 to vector<128x128xf32>
      %c0_10 = arith.constant 0 : index
      %c0_11 = arith.constant 0 : index
      %18 = vector.load %arg8[%c0_10, %c0_11] : memref<128x128xf32, #tpu.memory_space<vmem>>, vector<128x128xf32>
      tpu.vector_store %arg8[%c0_10, %c0_11], %17 {strides = array<i32>} : memref<128x128xf32, #tpu.memory_space<vmem>>, vector<128x128xf32>,
    } else {
    }
    %c0 = arith.constant 0 : index
    %c0_1 = arith.constant 0 : index
    %3 = vector.load %arg2[%c0, %c0_1] : memref<128x128xi8, #tpu.memory_space<vmem>>, vector<128x128xi8>
    %4 = arith.sitofp %3 : vector<128x128xi8> to vector<128x128xf32>
    %5 = arith.truncf %4 : vector<128x128xf32> to vector<128x128xbf16>
    %c128_i32 = arith.constant 128 : i32
    %6 = arith.muli %arg1, %c128_i32 : i32
    %7 = tpu.assume_multiple %6, 128 : i32
    %8 = arith.index_cast %7 : i32 to index
    %c0_2 = arith.constant 0 : index
    %9 = vector.load %arg3[%8, %c0_2] : memref<128x128xbf16, #tpu.memory_space<vmem>>, vector<128x128xbf16>
    %c0_3 = arith.constant 0 : index
    %c0_4 = arith.constant 0 : index
    %10 = vector.load %arg8[%c0_3, %c0_4] : memref<128x128xf32, #tpu.memory_space<vmem>>, vector<128x128xf32>
    %cst = arith.constant dense<0.000000e+00> : vector<128x128xf32>
    %11 = tpu.matmul %5, %9, %cst {dimension_numbers = #tpu.dot_dimension_numbers<[1], [0], [0], [1], [0, 0, 1, 1], [], []>} : vector<128x128xbf16>, vector<128x128xbf16>, vector<128x128xf32> -> vector<128x128xf32>
    %12 = arith.addf %10, %11 : vector<128x128xf32>
    %c0_5 = arith.constant 0 : index
    %c0_6 = arith.constant 0 : index
    %13 = vector.load %arg8[%c0_5, %c0_6] : memref<128x128xf32, #tpu.memory_space<vmem>>, vector<128x128xf32>
    tpu.vector_store %arg8[%c0_5, %c0_6], %12 {strides = array<i32>} : memref<128x128xf32, #tpu.memory_space<vmem>>, vector<128x128xf32>,
    %c0_i32_7 = arith.constant 0 : i32
    %14 = arith.cmpi eq, %arg1, %c0_i32_7 : i32
    %15 = arith.extui %14 : i1 to i32
    %c0_i32_8 = arith.constant 0 : i32
    %16 = arith.cmpi ne, %15, %c0_i32_8 : i32
    scf.if %16 {
      %c0_9 = arith.constant 0 : index
      %c0_10 = arith.constant 0 : index
      %17 = vector.load %arg4[%c0_9, %c0_10] : memref<128x1xf32, #tpu.memory_space<vmem>>, vector<128x1xf32>
      %c0_11 = arith.constant 0 : index
      %c0_12 = arith.constant 0 : index
      %18 = vector.load %arg8[%c0_11, %c0_12] : memref<128x128xf32, #tpu.memory_space<vmem>>, vector<128x128xf32>
      %19 = vector.broadcast %17 : vector<128x1xf32> to vector<128x128xf32>
      %20 = arith.mulf %18, %19 : vector<128x128xf32>
      %21 = arith.truncf %20 : vector<128x128xf32> to vector<128x128xbf16>
      %c0_13 = arith.constant 0 : index
      %c0_14 = arith.constant 0 : index
      %22 = vector.load %arg5[%c0_13, %c0_14] : memref<128x128xbf16, #tpu.memory_space<vmem>>, vector<128x128xbf16>
      %cst_15 = arith.constant dense<0.000000e+00> : vector<128x128xf32>
      %23 = tpu.matmul %21, %22, %cst_15 {dimension_numbers = #tpu.dot_dimension_numbers<[1], [0], [0], [1], [0, 0, 1, 1], [], []>} : vector<128x128xbf16>, vector<128x128xbf16>, vector<128x128xf32> -> vector<128x128xf32>
      %c0_16 = arith.constant 0 : index
      %c0_17 = arith.constant 0 : index
      %24 = vector.load %arg6[%c0_16, %c0_17] : memref<1x128xf32, #tpu.memory_space<vmem>>, vector<1x128xf32>
      %25 = vector.broadcast %24 : vector<1x128xf32> to vector<128x128xf32>
      %26 = arith.addf %23, %25 : vector<128x128xf32>
      %cst_18 = arith.constant 0.000000e+00 : f32
      %27 = vector.broadcast %cst_18 : f32 to vector<128x128xf32>
      %28 = arith.maximumf %26, %27 : vector<128x128xf32>
      %29 = vector.broadcast %17 : vector<128x1xf32> to vector<128x128xf32>
      %30 = arith.mulf %28, %29 : vector<128x128xf32>
      %31 = arith.truncf %30 : vector<128x128xf32> to vector<128x128xbf16>
      %c0_19 = arith.constant 0 : index
      %c0_20 = arith.constant 0 : index
      %32 = vector.load %arg7[%c0_19, %c0_20] : memref<128x128xbf16, #tpu.memory_space<vmem>>, vector<128x128xbf16>
      tpu.vector_store %arg7[%c0_19, %c0_20], %31 {strides = array<i32>} : memref<128x128xbf16, #tpu.memory_space<vmem>>, vector<128x128xbf16>,
    } else {
    }
    return
  }
  func.func @transform_0(%arg0: i32, %arg1: i32) -> (i32, i32) {
    %c0_i32 = arith.constant 0 : i32
    return %arg0, %arg1 : i32, i32
  }
  func.func @transform_1(%arg0: i32, %arg1: i32) -> (i32, i32) {
    %c0_i32 = arith.constant 0 : i32
    %c0_i32_0 = arith.constant 0 : i32
    %c0_i32_1 = arith.constant 0 : i32
    return %c0_i32, %c0_i32_0 : i32, i32
  }
  func.func @transform_2(%arg0: i32, %arg1: i32) -> (i32, i32) {
    %c0_i32 = arith.constant 0 : i32
    %c0_i32_0 = arith.constant 0 : i32
    return %arg0, %c0_i32 : i32, i32
  }
  func.func @transform_3(%arg0: i32, %arg1: i32) -> (i32, i32) {
    %c0_i32 = arith.constant 0 : i32
    %c0_i32_0 = arith.constant 0 : i32
    %c0_i32_1 = arith.constant 0 : i32
    return %c0_i32, %c0_i32_0 : i32, i32
  }
  func.func @transform_4(%arg0: i32, %arg1: i32) -> (i32, i32) {
    %c0_i32 = arith.constant 0 : i32
    %c0_i32_0 = arith.constant 0 : i32
    %c0_i32_1 = arith.constant 0 : i32
    return %c0_i32, %c0_i32_0 : i32, i32
  }
  func.func @transform_5(%arg0: i32, %arg1: i32) -> (i32, i32) {
    %c0_i32 = arith.constant 0 : i32
    %c0_i32_0 = arith.constant 0 : i32
    return %arg0, %c0_i32 : i32, i32
  }
}

</mosaic_0001>

<bundles_post_ra>
// kernel: tpu_custom_call.1
= control target key start
LH: loop header
LB: loop body
LE: loop exit
PB: predicated region body
PF: predicated region fallthrough
CT: control target
= control target key end

     0   :  { %10 = vsyncpa [#allocation4], 0  ;;  %s1227_s0 = inlined_call_operand.hbm [shape: s8[128,128], index: 0, kind: input, shape index: {}]   ;;  %s1228_s1 = inlined_call_operand.vmem [shape: bf16[128,128], index: 1, kind: input, shape index: {}]   ;;  %s1229_s2 = inlined_call_operand.vmem [shape: f32[128,1], index: 2, kind: input, shape index: {}]   ;;  %s1230_s3 = inlined_call_operand.vmem [shape: bf16[128,128], index: 3, kind: input, shape index: {}]   ;;  %s1231_s4 = inlined_call_operand.vmem [shape: f32[1,128], index: 4, kind: input, shape index: {}]   ;;  %s1232_s5 = inlined_call_operand.hbm [shape: bf16[128,128], index: 5, kind: output, shape index: {}]  }
   0x1   :  { %11 = vsyncpa [#allocation5], 0  ;;  %s985_s18 = smov [#allocation3]   ;;  %s937_s22 = scalar_lea.hbm %s1227_s0, 512 }
   0x2   :  { %s17_s19 = sshll.u32 %s985_s18, 4  ;;  %p938_p0 = scmp.ne.s32.totalorder %s1227_s0, %s937_s22  ;;  %s18_s19 = int_to_ptr.vmem [resolvable:$true] %s17_s19 }
   0x3   :  { %p941_p1 = scmp.lt.u32.totalorder %s937_s22, %s1227_s0 }
   0x5   :  { %p943_p2 = pnand %p941_p1, %p938_p0 }
   0x7   :  { %946 = shalt.err (!%p943_p2)
}
   0x8   :  { %s947_s27 = scalar_lea.vmem %s18_s19, 512  ;;  %p952_p4 = scmp.lt.s32.totalorder %s18_s19, %s18_s19 }
   0x9   :  { %p948_p3 = scmp.ne.s32.totalorder %s18_s19, %s947_s27  ;;  %p953_p5 = scmp.lt.s32.totalorder %s947_s27, %s947_s27 }
   0xb   :  { %p954_p6 = por %p953_p5, %p952_p4 }
   0xd   :  { %p955_p7 = pnand %p954_p6, %p948_p3 }
   0xf   :  { %958 = shalt.err (!%p955_p7)
}
  0x10   :  { %s986_s28 = smov 128   ;;  %s987_s29 = smov 8  }
  0x11   :  { %23 = dma.hbm_to_vmem [thread:$0]  %s1227_s0, 512, %s18_s19, [#allocation4], %s986_s28, %s986_s28, %s987_s29  }
  0x12   :  { %981 = dma.done.wait [#allocation4], 512  }
  0x13   :  { %982 = vsyncadd [#allocation4], 4294966784  ;;  %v988_v0 = vmov 0   ;;  %v921_v1 = vld [vmem:[%s1228_s1] sm:$0xff]   ;;  %v922_v2 = vld [vmem:[%s1228_s1 + $0x8] sm:$0xff]  }
  0x14   :  { %919 = vset.pattern.permute.xlu0 %v988_v0  ;;  %920 = vset.pattern.permute.xlu1 %v988_v0  ;;  %v923_v3 = vld [vmem:[%s1228_s1 + $0x10] sm:$0xff]   ;;  %v924_v4 = vld [vmem:[%s1228_s1 + $0x18] sm:$0xff]   ;;  %v56_v5 = vld [vmem:[#allocation3] sm:$0xff] }
  0x15   :  { %848 = vmatprep.subr.bf16.mxu0 %v921_v1  ;;  %v60_v6 = vunpack.c.l.s8.bf16 %v56_v5  ;;  %v285_v7 = vld [vmem:[%s1229_s2] sm:$0xff]  ;;  %v287_v8 = vld [vmem:[%s1229_s2 + $0x10] sm:$0xff]  ;;  %v286_v9 = vld [vmem:[%s1229_s2 + $0x8] sm:$0xff]  ;;  %v61_v29 = vunpack.c.h.s8.bf16 %v56_v5 }
  0x16   :  { %849 = vmatpush3.bf16.msra.mxu0 %v921_v1  ;;  %319 = vperm.xlu0 %919, %v285_v7   ;;  %v288_v10 = vld [vmem:[%s1229_s2 + $0x18] sm:$0xff]  ;;  %v925_v11 = vld [vmem:[%s1228_s1 + $0x20] sm:$0xff]   ;;  %v926_v12 = vld [vmem:[%s1228_s1 + $0x28] sm:$0xff]  }
  0x17   :  { %850 = vmatprep.subr.bf16.mxu0 %v922_v2  ;;  %329 = vperm.xlu1 %920, %v287_v8   ;;  %v289_v13 = vld [vmem:[%s1229_s2 + $0x20] sm:$0xff]  ;;  %v290_v14 = vld [vmem:[%s1229_s2 + $0x28] sm:$0xff]  ;;  %v291_v16 = vld [vmem:[%s1229_s2 + $0x30] sm:$0xff] }
  0x18   :  { %864 = vmatprep.mubr.bf16.mxu0 %v60_v6  ;;  %v929_v15 = vld [vmem:[%s1230_s3] sm:$0xff]   ;;  %v292_v17 = vld [vmem:[%s1229_s2 + $0x38] sm:$0xff]  ;;  %v930_v18 = vld [vmem:[%s1230_s3 + $0x8] sm:$0xff]  }
  0x19   :  { %880 = vmatprep.subr.bf16.mxu1 %v929_v15  ;;  %v927_v19 = vld [vmem:[%s1228_s1 + $0x30] sm:$0xff]   ;;  %v293_v21 = vld [vmem:[%s1229_s2 + $0x40] sm:$0xff]  ;;  %v294_v22 = vld [vmem:[%s1229_s2 + $0x48] sm:$0xff] }
  0x1a   :  { %851 = vmatpush3.bf16.msra.mxu0 %v922_v2  ;;  %324 = vperm.xlu0 %919, %v286_v9   ;;  %v931_v20 = vld [vmem:[%s1230_s3 + $0x10] sm:$0xff]   ;;  %v928_v23 = vld [vmem:[%s1228_s1 + $0x38] sm:$0xff]   ;;  %v57_v27 = vld [vmem:[#allocation3 + $0x8] sm:$0xff] }
  0x1b   :  { %852 = vmatprep.subr.bf16.mxu0 %v923_v3  ;;  %334 = vperm.xlu1 %920, %v288_v10   ;;  %v932_v24 = vld [vmem:[%s1230_s3 + $0x18] sm:$0xff]   ;;  %v295_v25 = vld [vmem:[%s1229_s2 + $0x50] sm:$0xff]  ;;  %v933_v28 = vld [vmem:[%s1230_s3 + $0x20] sm:$0xff]   ;;  %v62_v30 = vunpack.c.l.s8.bf16 %v57_v27  ;;  %v63_v37 = vunpack.c.h.s8.bf16 %v57_v27 }
  0x1c   :  { %881 = vmatpush3.bf16.msra.mxu1 %v929_v15  ;;  %v296_v26 = vld [vmem:[%s1229_s2 + $0x58] sm:$0xff]  ;;  %v297_v31 = vld [vmem:[%s1229_s2 + $0x60] sm:$0xff]  ;;  %v298_v32 = vld [vmem:[%s1229_s2 + $0x68] sm:$0xff] }
  0x1d   :  { %882 = vmatprep.subr.bf16.mxu1 %v930_v18  ;;  %v934_v33 = vld [vmem:[%s1230_s3 + $0x28] sm:$0xff]   ;;  %v299_v34 = vld [vmem:[%s1229_s2 + $0x70] sm:$0xff]  ;;  %v300_v36 = vld [vmem:[%s1229_s2 + $0x78] sm:$0xff] }
  0x1e   :  { %853 = vmatpush3.bf16.msra.mxu0 %v923_v3  ;;  %339 = vperm.xlu0 %919, %v289_v13   ;;  %v58_v35 = vld [vmem:[#allocation3 + $0x10] sm:$0xff]  ;;  %v59_v39 = vld [vmem:[#allocation3 + $0x18] sm:$0xff] }
  0x1f   :  { %854 = vmatprep.subr.bf16.mxu0 %v924_v4  ;;  %344 = vperm.xlu1 %920, %v290_v14   ;;  %v64_v38 = vunpack.c.l.s8.bf16 %v58_v35  ;;  %v65_v40 = vunpack.c.h.s8.bf16 %v58_v35  ;;  %v66_v41 = vunpack.c.l.s8.bf16 %v59_v39  ;;  %v67_v42 = vunpack.c.h.s8.bf16 %v59_v39  ;;  %v935_v43 = vld [vmem:[%s1230_s3 + $0x30] sm:$0xff]   ;;  %v936_v44 = vld [vmem:[%s1230_s3 + $0x38] sm:$0xff]  }
  0x20   :  { %883 = vmatpush3.bf16.msra.mxu1 %v930_v18 }
  0x21   :  { %884 = vmatprep.subr.bf16.mxu1 %v931_v20 }
  0x22   :  { %855 = vmatpush3.bf16.msra.mxu0 %v924_v4  ;;  %349 = vperm.xlu0 %919, %v291_v16  }
  0x23   :  { %856 = vmatprep.subr.bf16.mxu0 %v925_v11  ;;  %354 = vperm.xlu1 %920, %v292_v17  }
  0x24   :  { %885 = vmatpush3.bf16.msra.mxu1 %v931_v20 }
  0x25   :  { %886 = vmatprep.subr.bf16.mxu1 %v932_v24 }
  0x26   :  { %857 = vmatpush3.bf16.msra.mxu0 %v925_v11  ;;  %359 = vperm.xlu0 %919, %v293_v21  }
  0x27   :  { %858 = vmatprep.subr.bf16.mxu0 %v926_v12  ;;  %364 = vperm.xlu1 %920, %v294_v22  }
  0x28   :  { %887 = vmatpush3.bf16.msra.mxu1 %v932_v24 }
  0x29   :  { %888 = vmatprep.subr.bf16.mxu1 %v933_v28 }
  0x2a   :  { %859 = vmatpush3.bf16.msra.mxu0 %v926_v12  ;;  %369 = vperm.xlu0 %919, %v295_v25  }
  0x2b   :  { %860 = vmatprep.subr.bf16.mxu0 %v927_v19  ;;  %374 = vperm.xlu1 %920, %v296_v26  }
  0x2c   :  { %889 = vmatpush3.bf16.msra.mxu1 %v933_v28 }
  0x2d   :  { %890 = vmatprep.subr.bf16.mxu1 %v934_v33 }
  0x2e   :  { %861 = vmatpush3.bf16.msra.mxu0 %v927_v19  ;;  %379 = vperm.xlu0 %919, %v297_v31  }
  0x2f   :  { %862 = vmatprep.subr.bf16.mxu0 %v928_v23  ;;  %384 = vperm.xlu1 %920, %v298_v32  }
  0x30   :  { %891 = vmatpush3.bf16.msra.mxu1 %v934_v33 }
  0x31   :  { %892 = vmatprep.subr.bf16.mxu1 %v935_v43 }
  0x32   :  { %863 = vmatpush3.bf16.msra.mxu0 %v928_v23  ;;  %389 = vperm.xlu0 %919, %v299_v34  }
  0x33   :  { %394 = vperm.xlu1 %920, %v300_v36  }
  0x34   :  { %893 = vmatpush3.bf16.msra.mxu1 %v935_v43 }
  0x35   :  { %865 = vmatmul.mubr.bf16.vlgmr.msra.gmra.mrb[0].mxu0 %v61_v29  ;;  %894 = vmatprep.subr.bf16.mxu1 %v936_v44 }
  0x36   :  { %868 = vmatprep.mubr.bf16.mxu0 %v62_v30 }
  0x38   :  { %895 = vmatpush3.bf16.msra.mxu1 %v936_v44 }
  0x3d   :  { %869 = vmatmul.mubr.bf16.gmra.mrb[4].mxu0 %v63_v37  ;;  %v1181_v37 = vld [vmem:[%s1231_s4] ss:$0 sm:$0xff]  ;;  %s989_s4 = smov [#allocation6]  }
  0x3e   :  { %872 = vmatprep.mubr.bf16.mxu0 %v64_v38  ;;  %s706_s17 = sshll.u32 %s989_s4, 4  ;;  %s707_s17 = int_to_ptr.vmem [resolvable:$true] %s706_s17 }
  0x3f   :  { %s959_s18 = scalar_lea.vmem %s707_s17, 1024  ;;  %p964_p9 = scmp.lt.s32.totalorder %s707_s17, %s707_s17 }
  0x40   :  { %p960_p8 = scmp.ne.s32.totalorder %s707_s17, %s959_s18  ;;  %p965_p10 = scmp.lt.s32.totalorder %s959_s18, %s959_s18 }
  0x42   :  { %p966_p11 = por %p965_p10, %p964_p9 }
  0x44   :  { %p967_p12 = pnand %p966_p11, %p960_p8 }
  0x45   :  { %873 = vmatmul.mubr.bf16.gmra.mrb[8].mxu0 %v65_v40 }
  0x46   :  { %876 = vmatprep.mubr.bf16.mxu0 %v66_v41 }
  0x4d   :  { %877 = vmatmul.mubr.bf16.gmra.mrb[12].mxu0 %v67_v42 }
  0x95   :  { %v1130_v45 = vpop.permute.xlu0 %319 }
  0x96   :  { %v1132_v46 = vpop.permute.xlu1 %329 }
  0x99   :  { %v1134_v47 = vpop.permute.xlu0 %324 }
  0x9a   :  { %v1136_v48 = vpop.permute.xlu1 %334 }
  0x9d   :  { %v1138_v49 = vpop.permute.xlu0 %339 }
  0x9e   :  { %v1140_v50 = vpop.permute.xlu1 %344 }
  0xa1   :  { %v1142_v52 = vpop.permute.xlu0 %349 }
  0xa2   :  { %v1144_v54 = vpop.permute.xlu1 %354 }
  0xa5   :  { %v1150_v63 = vpop.permute.xlu0 %359 }
  0xa6   :  { %v1152_v0 = vpop.permute.xlu1 %364 }
  0xa9   :  { %v1158_v9 = vpop.permute.xlu0 %369 }
  0xaa   :  { %v1160_v11 = vpop.permute.xlu1 %374 }
  0xad   :  { %v1162_v16 = vpop.permute.xlu0 %379 }
  0xae   :  { %v1166_v20 = vpop.permute.xlu1 %384 }
  0xb1   :  { %v1170_v26 = vpop.permute.xlu0 %389 }
  0xb2   :  { %v1172_v28 = vpop.permute.xlu1 %394 }
 0x108   :  { %v866_v51 = vpop.f32.mrb[0].mxu0 }
 0x109   :  { %v187_v53 = vpop.f32.mrb[1].mxu0  ;;  %v399_v56 = vmul.f32 %v866_v51, %v1132_v46 }
 0x10a   :  { %v867_v55 = vpop.f32.mrb[2].mxu0  ;;  %v397_v59 = vmul.f32 %v1130_v45, %v187_v53 }
 0x10b   :  { %v400_v57 = vmul.f32 %v867_v55, %v1136_v48  ;;  %v190_v58 = vpop.f32.mrb[3].mxu0 }
 0x10c   :  { %v398_v60 = vmul.f32 %v1134_v47, %v190_v58 }
 0x10d   :  { %v414_v61 = vpack.c.bf16 %v400_v57, %v399_v56 }
 0x10e   :  { %v413_v62 = vpack.c.bf16 %v398_v60, %v397_v59 }
 0x110   :  { %v870_v1 = vpop.f32.mrb[4].mxu0  ;;  %896 = vmatprep.mubr.bf16.mxu1 %v413_v62 }
 0x111   :  { %v203_v2 = vpop.f32.mrb[5].mxu0  ;;  %897 = vmatmul.mubr.bf16.vlgmr.msra.gmra.mrb[0].mxu1 %v414_v61  ;;  %v403_v4 = vmul.f32 %v870_v1, %v1142_v52 }
 0x112   :  { %v871_v3 = vpop.f32.mrb[6].mxu0  ;;  %v401_v7 = vmul.f32 %v1138_v49, %v203_v2 }
 0x113   :  { %v404_v5 = vmul.f32 %v871_v3, %v1144_v54  ;;  %v206_v6 = vpop.f32.mrb[7].mxu0 }
 0x114   :  { %v402_v8 = vmul.f32 %v1140_v50, %v206_v6 }
 0x115   :  { %v416_v10 = vpack.c.bf16 %v404_v5, %v403_v4 }
 0x116   :  { %v415_v12 = vpack.c.bf16 %v402_v8, %v401_v7 }
 0x118   :  { %v874_v13 = vpop.f32.mrb[8].mxu0  ;;  %900 = vmatprep.mubr.bf16.mxu1 %v415_v12 }
 0x119   :  { %v219_v14 = vpop.f32.mrb[9].mxu0  ;;  %901 = vmatmul.mubr.bf16.gmra.mrb[4].mxu1 %v416_v10  ;;  %v407_v17 = vmul.f32 %v874_v13, %v1158_v9 }
 0x11a   :  { %v875_v15 = vpop.f32.mrb[10].mxu0  ;;  %v405_v21 = vmul.f32 %v1150_v63, %v219_v14 }
 0x11b   :  { %v408_v18 = vmul.f32 %v875_v15, %v1160_v11  ;;  %v222_v19 = vpop.f32.mrb[11].mxu0 }
 0x11c   :  { %v406_v22 = vmul.f32 %v1152_v0, %v222_v19 }
 0x11d   :  { %v418_v23 = vpack.c.bf16 %v408_v18, %v407_v17 }
 0x11e   :  { %v417_v24 = vpack.c.bf16 %v406_v22, %v405_v21 }
 0x120   :  { %v878_v25 = vpop.f32.mrb[12].mxu0  ;;  %904 = vmatprep.mubr.bf16.mxu1 %v417_v24 }
 0x121   :  { %v235_v27 = vpop.f32.mrb[13].mxu0  ;;  %905 = vmatmul.mubr.bf16.gmra.mrb[8].mxu1 %v418_v23  ;;  %v411_v30 = vmul.f32 %v878_v25, %v1170_v26 }
 0x122   :  { %v879_v29 = vpop.f32.mrb[14].mxu0  ;;  %v409_v33 = vmul.f32 %v1162_v16, %v235_v27 }
 0x123   :  { %v412_v31 = vmul.f32 %v879_v29, %v1172_v28  ;;  %v238_v32 = vpop.f32.mrb[15].mxu0 }
 0x124   :  { %v410_v34 = vmul.f32 %v1166_v20, %v238_v32 }
 0x125   :  { %v420_v35 = vpack.c.bf16 %v412_v31, %v411_v30 }
 0x126   :  { %v419_v36 = vpack.c.bf16 %v410_v34, %v409_v33 }
 0x128   :  { %908 = vmatprep.mubr.bf16.mxu1 %v419_v36 }
 0x129   :  { %909 = vmatmul.mubr.bf16.gmra.mrb[12].mxu1 %v420_v35 }
 0x1e4   :  { %v898_v38 = vpop.f32.mrb[0].mxu1 }
 0x1e5   :  { %v535_v39 = vadd.f32 %v898_v38, %v1181_v37  ;;  %v526_v40 = vpop.f32.mrb[1].mxu1 }
 0x1e6   :  { %v527_v41 = vadd.f32 %v1181_v37, %v526_v40  ;;  %v899_v42 = vpop.f32.mrb[2].mxu1 }
 0x1e7   :  { %v591_v43 = vmax.f32 %v535_v39, 0.0  ;;  %v538_v44 = vadd.f32 %v899_v42, %v1181_v37  ;;  %v529_v51 = vpop.f32.mrb[3].mxu1 }
 0x1e8   :  { %v589_v53 = vmax.f32 %v527_v41, 0.0  ;;  %v530_v55 = vadd.f32 %v1181_v37, %v529_v51 }
 0x1e9   :  { %v592_v56 = vmax.f32 %v538_v44, 0.0  ;;  %v607_v58 = vmul.f32 %v591_v43, %v1132_v46 }
 0x1ea   :  { %v590_v57 = vmax.f32 %v530_v55, 0.0  ;;  %v605_v60 = vmul.f32 %v589_v53, %v1130_v45 }
 0x1eb   :  { %v608_v59 = vmul.f32 %v592_v56, %v1136_v48 }
 0x1ec   :  { %v606_v61 = vmul.f32 %v590_v57, %v1134_v47  ;;  %v902_v62 = vpop.f32.mrb[4].mxu1 }
 0x1ed   :  { %v777_v1 = vpack.c.bf16 %v608_v59, %v607_v58  ;;  %v551_v2 = vadd.f32 %v902_v62, %v1181_v37  ;;  %v542_v3 = vpop.f32.mrb[5].mxu1 }
 0x1ee   :  { %v772_v4 = vpack.c.bf16 %v606_v61, %v605_v60  ;;  %v543_v5 = vadd.f32 %v1181_v37, %v542_v3  ;;  %v903_v6 = vpop.f32.mrb[6].mxu1 }
 0x1ef   :  { %809 = vst [vmem:[#allocation6 + $0x8] sm:$0xff] %v777_v1   ;;  %v595_v7 = vmax.f32 %v551_v2, 0.0  ;;  %v554_v8 = vadd.f32 %v903_v6, %v1181_v37  ;;  %v545_v46 = vpop.f32.mrb[7].mxu1 }
 0x1f0   :  { %773 = vst [vmem:[#allocation6] sm:$0xff] %v772_v4   ;;  %v593_v48 = vmax.f32 %v543_v5, 0.0  ;;  %v546_v45 = vadd.f32 %v1181_v37, %v545_v46 }
 0x1f1   :  { %v596_v10 = vmax.f32 %v554_v8, 0.0  ;;  %v611_v12 = vmul.f32 %v595_v7, %v1142_v52 }
 0x1f2   :  { %v594_v47 = vmax.f32 %v546_v45, 0.0  ;;  %v609_v14 = vmul.f32 %v593_v48, %v1138_v49 }
 0x1f3   :  { %v612_v13 = vmul.f32 %v596_v10, %v1144_v54 }
 0x1f4   :  { %v610_v15 = vmul.f32 %v594_v47, %v1140_v50  ;;  %v906_v17 = vpop.f32.mrb[8].mxu1 }
 0x1f5   :  { %v787_v18 = vpack.c.bf16 %v612_v13, %v611_v12  ;;  %v567_v19 = vadd.f32 %v906_v17, %v1181_v37  ;;  %v558_v21 = vpop.f32.mrb[9].mxu1 }
 0x1f6   :  { %v782_v22 = vpack.c.bf16 %v610_v15, %v609_v14  ;;  %v559_v23 = vadd.f32 %v1181_v37, %v558_v21  ;;  %v907_v24 = vpop.f32.mrb[10].mxu1 }
 0x1f7   :  { %811 = vst [vmem:[#allocation6 + $0x18] sm:$0xff] %v787_v18   ;;  %v599_v25 = vmax.f32 %v567_v19, 0.0  ;;  %v570_v27 = vadd.f32 %v907_v24, %v1181_v37  ;;  %v561_v52 = vpop.f32.mrb[11].mxu1 }
 0x1f8   :  { %810 = vst [vmem:[#allocation6 + $0x10] sm:$0xff] %v782_v22   ;;  %v597_v54 = vmax.f32 %v559_v23, 0.0  ;;  %v562_v49 = vadd.f32 %v1181_v37, %v561_v52 }
 0x1f9   :  { %v600_v29 = vmax.f32 %v570_v27, 0.0  ;;  %v615_v30 = vmul.f32 %v599_v25, %v1158_v9 }
 0x1fa   :  { %v598_v50 = vmax.f32 %v562_v49, 0.0  ;;  %v613_v32 = vmul.f32 %v597_v54, %v1150_v63 }
 0x1fb   :  { %v616_v31 = vmul.f32 %v600_v29, %v1160_v11 }
 0x1fc   :  { %v614_v33 = vmul.f32 %v598_v50, %v1152_v0  ;;  %v910_v34 = vpop.f32.mrb[12].mxu1 }
 0x1fd   :  { %v797_v35 = vpack.c.bf16 %v616_v31, %v615_v30  ;;  %v583_v36 = vadd.f32 %v910_v34, %v1181_v37  ;;  %v574_v38 = vpop.f32.mrb[13].mxu1 }
 0x1fe   :  { %v792_v39 = vpack.c.bf16 %v614_v33, %v613_v32  ;;  %v575_v40 = vadd.f32 %v1181_v37, %v574_v38  ;;  %v911_v41 = vpop.f32.mrb[14].mxu1 }
 0x1ff   :  { %813 = vst [vmem:[#allocation6 + $0x28] sm:$0xff] %v797_v35   ;;  %v603_v42 = vmax.f32 %v583_v36, 0.0  ;;  %v586_v43 = vadd.f32 %v911_v41, %v1181_v37  ;;  %v577_v9 = vpop.f32.mrb[15].mxu1 }
 0x200   :  { %812 = vst [vmem:[#allocation6 + $0x20] sm:$0xff] %v792_v39   ;;  %v601_v11 = vmax.f32 %v575_v40, 0.0  ;;  %v578_v63 = vadd.f32 %v1181_v37, %v577_v9 }
 0x201   :  { %v604_v44 = vmax.f32 %v586_v43, 0.0  ;;  %v619_v51 = vmul.f32 %v603_v42, %v1170_v26 }
 0x202   :  { %v602_v0 = vmax.f32 %v578_v63, 0.0  ;;  %v617_v55 = vmul.f32 %v601_v11, %v1162_v16 }
 0x203   :  { %v620_v53 = vmul.f32 %v604_v44, %v1172_v28 }
 0x204   :  { %v618_v56 = vmul.f32 %v602_v0, %v1166_v20 }
 0x205   :  { %v807_v57 = vpack.c.bf16 %v620_v53, %v619_v51 }
 0x206   :  { %v802_v58 = vpack.c.bf16 %v618_v56, %v617_v55 }
 0x207   :  { %815 = vst [vmem:[#allocation6 + $0x38] sm:$0xff] %v807_v57  }
 0x208   :  { %814 = vst [vmem:[#allocation6 + $0x30] sm:$0xff] %v802_v58  }
 0x209   :  { %970 = shalt.err (!%p967_p12)
}
 0x20a   :  { %s971_s21 = scalar_lea.hbm %s1232_s5, 1024 }
 0x20b   :  { %p972_p13 = scmp.ne.s32.totalorder %s1232_s5, %s971_s21  ;;  %p975_p0 = scmp.lt.u32.totalorder %s971_s21, %s1232_s5 }
 0x20d   :  { %p977_p1 = pnand %p975_p0, %p972_p13 }
 0x20f   :  { %980 = shalt.err (!%p977_p1)
}
 0x210   :  { %s990_s26 = smov 64   ;;  %s991_s27 = smov 4  }
 0x211   :  { %712 = dma.vmem_to_hbm [thread:$0]  %s707_s17, 1024, %s1232_s5, [#allocation5], %s990_s26, %s990_s26, %s991_s27  }
 0x212   :  { %983 = dma.done.wait [#allocation5], 1024  }
 0x213   :  { %984 = vsyncadd [#allocation5], 4294966272 }
 0x214   :  { %716 = vsyncpa [#allocation4], 1 }
 0x215   :  { %717 = vsyncpa [#allocation5], 1 }

</bundles_post_ra>
